<compile_context>
chip_gen: v5e
topology: v5e:2x2
jax: 0.10.0
libtpu: 0.0.40
codegen_flags: <defaults>
</compile_context>

<pallas_src>
import jax
import jax.numpy as jnp
from jax.experimental import pallas as pl
from jax.experimental.pallas import tpu as pltpu


def _round_up(x, m):
    return ((x + m - 1) // m) * m


# --------------------------------------------------------------------------
# Kernel 1: fused class table  PReLU(emb @ W.T + b), computed once.
# --------------------------------------------------------------------------
def _fused_table_kernel(alpha_ref, emb_ref, w_ref, b_ref, table_ref):
    # emb_ref:   (C_pad, E)   padded embedding table
    # w_ref:     (E, E)       torch Linear weight, stored (out_features, in_features)
    # b_ref:     (1, E)       bias
    # alpha_ref: (1,)         PReLU slope (SMEM scalar)
    pre = jax.lax.dot_general(
        emb_ref[...], w_ref[...],
        dimension_numbers=(((1,), (1,)), ((), ())),   # emb @ W.T, W used as stored
        preferred_element_type=jnp.float32,
    )
    pre = pre + b_ref[...]
    alpha = alpha_ref[0]
    table_ref[...] = jnp.where(pre > 0.0, pre, alpha * pre).astype(table_ref.dtype)


# --------------------------------------------------------------------------
# Kernel 2: per-token gather from the fused table (one-hot MXU matmul).
# --------------------------------------------------------------------------
def _gather_kernel(idx_ref, table_ref, o_ref):
    # idx_ref:   (1, tm)      int32 class indices, lane-dense (tokens on lanes)
    # table_ref: (C_pad, E)   fused PReLU(emb @ W.T + b) table (VMEM resident)
    # o_ref:     (tm, E)      output tile (tokens on sublanes, E lane-dense)
    tbl = table_ref[...]
    c_pad = tbl.shape[0]
    tm = o_ref.shape[0]

    idx = idx_ref[...]                                               # (1, tm)
    # Transposed one-hot: class id on the sublane axis, tokens on lanes, so the index
    # operand never needs a lane->sublane relayout.  At most one 1.0 per column.
    classes = jax.lax.broadcasted_iota(jnp.int32, (c_pad, tm), 0)    # (C_pad, tm)
    onehot = (classes == idx).astype(tbl.dtype)                      # (C_pad, tm)

    # gathered[m, e] = sum_c onehot[c, m] * table[c, e]  (exact row selection).
    # onehot.T + standard dot is the battle-tested transposed-operand MXU pattern;
    # the XLU transpose rides a free slot and is hidden under the output DMA.
    gathered = jnp.dot(onehot.T, tbl, preferred_element_type=jnp.float32)   # (tm, E)

    # Garbage lanes in a partial last idx block only produce rows that Pallas masks
    # on store; out-of-range indices silently give all-zero rows (see header note).
    o_ref[...] = gathered.astype(o_ref.dtype)


# --------------------------------------------------------------------------
# Wrapper
# --------------------------------------------------------------------------
_TM_MIN = 256   # multiple of 128 (idx lane dim) and of 16 (bf16 output sublane packing)


def disease_embedding_forward(x_idx, emb_table, w, b, alpha, *,
                              tm=1024, out_dtype=jnp.float32):
    """x_idx: (B, S) integer class indices. Returns (B, S, E) in `out_dtype`."""
    B, S = x_idx.shape
    num_classes, E = emb_table.shape
    N = B * S
    # bf16 table + bf16 one-hot is an exact row selection (identical to f32-then-cast);
    # only used when the caller asked for bf16 output.
    table_dtype = jnp.bfloat16 if out_dtype == jnp.bfloat16 else jnp.float32

    # ---- Stage 1: fused table, one tiny (C_pad, E) x (E, E) matmul, runs once. ----
    C_pad = max(128, _round_up(num_classes, 128))
    emb_pad = jnp.pad(emb_table.astype(jnp.float32),
                      ((0, C_pad - num_classes), (0, 0)))
    b2 = b.reshape(1, E).astype(jnp.float32)
    alpha1 = alpha.reshape(1).astype(jnp.float32)

    table = pl.pallas_call(
        _fused_table_kernel,
        out_shape=jax.ShapeDtypeStruct((C_pad, E), table_dtype),
        grid_spec=pltpu.PrefetchScalarGridSpec(
            num_scalar_prefetch=0,
            grid=(1,),
            in_specs=[
                pl.BlockSpec(memory_space=pltpu.SMEM),           # alpha scalar
                pl.BlockSpec((C_pad, E), lambda i: (0, 0)),      # padded embedding
                pl.BlockSpec((E, E), lambda i: (0, 0)),          # weight (torch layout)
                pl.BlockSpec((1, E), lambda i: (0, 0)),          # bias
            ],
            out_specs=pl.BlockSpec((C_pad, E), lambda i: (0, 0)),
        ),
        compiler_params=pltpu.CompilerParams(
            dimension_semantics=("arbitrary",)),
    )(alpha1, emb_pad, w.astype(jnp.float32), b2)

    # ---- Stage 2: per-token gather, tiled over N with lane-dense indices. ----
    idx_flat = x_idx.reshape(1, N).astype(jnp.int32)        # lane-dense (tokens on lanes)
    if N >= _TM_MIN:
        # Throughput path: no output padding / out[:N] slice, no idx padding.
        # Partial last idx/out blocks are masked by Pallas.
        tm_eff = min(_round_up(tm, _TM_MIN),
                     _round_up(pl.cdiv(N, 2), _TM_MIN))      # >= 2 steps -> both v7x TCs busy
        tm_eff = max(_TM_MIN, tm_eff)                        # always <= N when N >= 256
        idx2d = idx_flat
        n_out = N
    else:
        # Latency path (tiny N): pad tokens up to one aligned tile; the trailing slice
        # below touches < 128 KiB and is negligible at this size.
        tm_eff = _TM_MIN
        idx2d = jnp.pad(idx_flat, ((0, 0), (0, _TM_MIN - N)))   # pad with class 0 (valid)
        n_out = _TM_MIN
    n_tiles = pl.cdiv(n_out, tm_eff)

    out = pl.pallas_call(
        _gather_kernel,
        out_shape=jax.ShapeDtypeStruct((n_out, E), out_dtype),
        grid_spec=pltpu.PrefetchScalarGridSpec(
            num_scalar_prefetch=0,
            grid=(n_tiles,),
            in_specs=[
                pl.BlockSpec((1, tm_eff), lambda i: (0, i)),     # lane-dense index tile
                pl.BlockSpec((C_pad, E), lambda i: (0, 0)),      # fused table (resident)
            ],
            out_specs=pl.BlockSpec((tm_eff, E), lambda i: (i, 0)),
        ),
        # "parallel": no cross-step state, so v7x may shard the token axis across its
        # 2 TensorCores; ~2 MiB live VMEM at tm=1024, no vmem_limit needed.
        compiler_params=pltpu.CompilerParams(
            dimension_semantics=("parallel",)),
    )(idx2d, table)

    if n_out != N:
        out = out[:N]
    return out.reshape(B, S, E)


# --------------------------------------------------------------------------
# Pure-JAX reference mirroring the PyTorch module (gather -> linear -> PReLU).
# --------------------------------------------------------------------------
def _reference(x_idx, emb_table, w, b, alpha):
    x = jnp.take(emb_table, x_idx.reshape(-1), axis=0)
    y = x @ w.T + b
    y = jnp.where(y > 0.0, y, alpha * y)
    return y.reshape(x_idx.shape + (emb_table.shape[1],))


if __name__ == "__main__":
    num_classes = 10
    embedding_dim = 128

    key = jax.random.PRNGKey(0)
    k_emb, k_w, k_b, k_i1, k_i2 = jax.random.split(key, 5)

    emb_table = jax.random.normal(k_emb, (num_classes, embedding_dim), jnp.float32)
    w = 0.05 * jax.random.normal(k_w, (embedding_dim, embedding_dim), jnp.float32)
    b = 0.05 * jax.random.normal(k_b, (embedding_dim,), jnp.float32)
    alpha = jnp.array(0.25, jnp.float32)          # nn.PReLU() default init

    # Case 1: tiny batch (latency path: single padded tile).
    x_small = jax.random.randint(k_i1, (2, 8), 0, num_classes, dtype=jnp.int32)
    out_small = jax.block_until_ready(
        disease_embedding_forward(x_small, emb_table, w, b, alpha))
    ref_small = _reference(x_small, emb_table, w, b, alpha)
    assert out_small.shape == (2, 8, embedding_dim)
    assert jnp.allclose(out_small, ref_small, atol=2e-5, rtol=2e-5), "small-N mismatch"

    # Case 2: larger batch (throughput path: lane-dense idx, 2 grid steps,
    # partial last block, no output padding / slice).
    x_big = jax.random.randint(k_i2, (3, 200), 0, num_classes, dtype=jnp.int32)
    out_big = jax.block_until_ready(
        disease_embedding_forward(x_big, emb_table, w, b, alpha))
    ref_big = _reference(x_big, emb_table, w, b, alpha)
    assert out_big.shape == (3, 200, embedding_dim)
    assert jnp.allclose(out_big, ref_big, atol=2e-5, rtol=2e-5), "large-N mismatch"

    print("KERNEL_OK")
</pallas_src>

<mosaic_0001>
module attributes {stable_mosaic.version = 11 : i64} {
  func.func @_fused_table_kernel(%arg0: i32, %arg1: memref<1xf32, #tpu.memory_space<smem>>, %arg2: memref<128x128xf32, #tpu.memory_space<vmem>>, %arg3: memref<128x128xf32, #tpu.memory_space<vmem>>, %arg4: memref<1x128xf32, #tpu.memory_space<vmem>>, %arg5: memref<128x128xf32, #tpu.memory_space<vmem>>) attributes {dimension_semantics = [#tpu.dimension_semantics<arbitrary>], iteration_bounds = array<i64: 1>, scalar_prefetch = 0 : i64, scratch_operands = 0 : i64, tpu.core_type = #tpu.core_type<tc>, window_params = [{transform_indices = @transform_0, window_bounds = array<i64: 1>}, {pipeline_mode = #tpu.pipeline_mode<synchronous>, transform_indices = @transform_1, window_bounds = array<i64: 128, 128>}, {pipeline_mode = #tpu.pipeline_mode<synchronous>, transform_indices = @transform_2, window_bounds = array<i64: 128, 128>}, {pipeline_mode = #tpu.pipeline_mode<synchronous>, transform_indices = @transform_3, window_bounds = array<i64: 1, 128>}, {pipeline_mode = #tpu.pipeline_mode<synchronous>, transform_indices = @transform_4, window_bounds = array<i64: 128, 128>}]} {
    %c0 = arith.constant 0 : index
    %c0_0 = arith.constant 0 : index
    %0 = vector.load %arg2[%c0, %c0_0] : memref<128x128xf32, #tpu.memory_space<vmem>>, vector<128x128xf32>
    %c0_1 = arith.constant 0 : index
    %c0_2 = arith.constant 0 : index
    %1 = vector.load %arg3[%c0_1, %c0_2] : memref<128x128xf32, #tpu.memory_space<vmem>>, vector<128x128xf32>
    %cst = arith.constant dense<0.000000e+00> : vector<128x128xf32>
    %2 = tpu.matmul %0, %1, %cst {dimension_numbers = #tpu.dot_dimension_numbers<[1], [1], [0], [0], [0, 0, 1, 0], [], []>} : vector<128x128xf32>, vector<128x128xf32>, vector<128x128xf32> -> vector<128x128xf32>
    %c0_3 = arith.constant 0 : index
    %c0_4 = arith.constant 0 : index
    %3 = vector.load %arg4[%c0_3, %c0_4] : memref<1x128xf32, #tpu.memory_space<vmem>>, vector<1x128xf32>
    %4 = vector.broadcast %3 : vector<1x128xf32> to vector<128x128xf32>
    %5 = arith.addf %2, %4 : vector<128x128xf32>
    %c0_5 = arith.constant 0 : index
    %6 = memref.load %arg1[%c0_5] : memref<1xf32, #tpu.memory_space<smem>>
    %cst_6 = arith.constant 0.000000e+00 : f32
    %7 = vector.broadcast %cst_6 : f32 to vector<128x128xf32>
    %8 = arith.cmpf ogt, %5, %7 : vector<128x128xf32>
    %9 = vector.broadcast %6 : f32 to vector<128x128xf32>
    %10 = arith.mulf %9, %5 : vector<128x128xf32>
    %11 = arith.select %8, %5, %10 : vector<128x128xi1>, vector<128x128xf32>
    %c0_7 = arith.constant 0 : index
    %c0_8 = arith.constant 0 : index
    %12 = vector.load %arg5[%c0_7, %c0_8] : memref<128x128xf32, #tpu.memory_space<vmem>>, vector<128x128xf32>
    tpu.vector_store %arg5[%c0_7, %c0_8], %11 {strides = array<i32>} : memref<128x128xf32, #tpu.memory_space<vmem>>, vector<128x128xf32>,
    return
  }
  func.func @transform_0(%arg0: i32) -> i32 {
    %c0_i32 = arith.constant 0 : i32
    %c0_i32_0 = arith.constant 0 : i32
    return %c0_i32 : i32
  }
  func.func @transform_1(%arg0: i32) -> (i32, i32) {
    %c0_i32 = arith.constant 0 : i32
    %c0_i32_0 = arith.constant 0 : i32
    %c0_i32_1 = arith.constant 0 : i32
    return %c0_i32, %c0_i32_0 : i32, i32
  }
  func.func @transform_2(%arg0: i32) -> (i32, i32) {
    %c0_i32 = arith.constant 0 : i32
    %c0_i32_0 = arith.constant 0 : i32
    %c0_i32_1 = arith.constant 0 : i32
    return %c0_i32, %c0_i32_0 : i32, i32
  }
  func.func @transform_3(%arg0: i32) -> (i32, i32) {
    %c0_i32 = arith.constant 0 : i32
    %c0_i32_0 = arith.constant 0 : i32
    %c0_i32_1 = arith.constant 0 : i32
    return %c0_i32, %c0_i32_0 : i32, i32
  }
  func.func @transform_4(%arg0: i32) -> (i32, i32) {
    %c0_i32 = arith.constant 0 : i32
    %c0_i32_0 = arith.constant 0 : i32
    %c0_i32_1 = arith.constant 0 : i32
    return %c0_i32, %c0_i32_0 : i32, i32
  }
}

</mosaic_0001>

<bundles_post_ra>
// kernel: tpu_custom_call.1
= control target key start
LH: loop header
LB: loop body
LE: loop exit
PB: predicated region body
PF: predicated region fallthrough
CT: control target
= control target key end

     0   :  { %10 = vsyncpa [#allocation4], 0  ;;  %s460_s0 = inlined_call_operand.<no memory space> [shape: f32[1], index: 0, kind: input, shape index: {}]   ;;  %s461_s1 = inlined_call_operand.hbm [shape: f32[128,128], index: 1, kind: input, shape index: {}]   ;;  %s462_s2 = inlined_call_operand.hbm [shape: f32[128,128], index: 2, kind: input, shape index: {}]   ;;  %s463_s3 = inlined_call_operand.vmem [shape: f32[1,128], index: 3, kind: input, shape index: {}]   ;;  %s464_s4 = inlined_call_operand.hbm [shape: f32[128,128], index: 4, kind: output, shape index: {}]  }
   0x1   :  { %11 = vsyncpa [#allocation7], 0 }
   0x2   :  { %12 = vsyncpa [#allocation5], 0  ;;  %s19_s17 = sshll.u32 %s461_s1, 4  ;;  %s370_s18 = smov [#allocation3]   ;;  %s20_s17 = int_to_ptr.hbm [resolvable:$true] %s19_s17 }
   0x3   :  { %s21_s19 = sshll.u32 %s370_s18, 4  ;;  %s32_s22 = sshll.u32 %s462_s2, 4  ;;  %s22_s19 = int_to_ptr.vmem [resolvable:$true] %s21_s19  ;;  %s33_s22 = int_to_ptr.hbm [resolvable:$true] %s32_s22 }
   0x4   :  { %s371_s23 = smov 128   ;;  %s372_s24 = smov 8  }
   0x5   :  { %27 = dma.hbm_to_vmem [thread:$0]  %s20_s17, 2048, %s22_s19, [#allocation4], %s371_s23, %s371_s23, %s372_s24  }
   0x6   :  { %s373_s25 = smov [#allocation6]  }
   0x7   :  { %s34_s26 = sshll.u32 %s373_s25, 4  ;;  %s35_s26 = int_to_ptr.vmem [resolvable:$true] %s34_s26 }
   0x8   :  { %40 = dma.hbm_to_vmem [thread:$0]  %s33_s22, 2048, %s35_s26, [#allocation7], %s371_s23, %s371_s23, %s372_s24  }
   0x9   :  { %364 = dma.done.wait [#allocation4], 2048  }
   0xa   :  { %365 = vsyncadd [#allocation4], 4294965248 }
   0xb   :  { %366 = dma.done.wait [#allocation7], 2048  }
   0xc   :  { %367 = vsyncadd [#allocation7], 4294965248  ;;  %v82_v0 = vld [vmem:[#allocation6 + $0x78] sm:$0xff]  ;;  %v81_v1 = vld [vmem:[#allocation6 + $0x70] sm:$0xff]  ;;  %v420_v34 = vstv %s460_s0  ;;  %s374_s0 = smov [#allocation8]   ;;  %s224_s5 = sshll.u32 %s464_s4, 4  ;;  %s225_s5 = int_to_ptr.hbm [resolvable:$true] %s224_s5 }
   0xd   :  { %239 = vmatpush.xpose.msra.mxu2 %v82_v0  ;;  %240 = vmatpush.xpose.msra.mxu3 %v82_v0  ;;  %v80_v2 = vld [vmem:[#allocation6 + $0x68] sm:$0xff]  ;;  %v79_v3 = vld [vmem:[#allocation6 + $0x60] sm:$0xff]  ;;  %v78_v4 = vld [vmem:[#allocation6 + $0x58] sm:$0xff] }
   0xe   :  { %87 = vmatpush.xpose.msra.mxu0 %v82_v0  ;;  %238 = vmatpush.xpose.msra.mxu1 %v82_v0  ;;  %v77_v5 = vld [vmem:[#allocation6 + $0x50] sm:$0xff]  ;;  %v76_v6 = vld [vmem:[#allocation6 + $0x48] sm:$0xff]  ;;  %v75_v7 = vld [vmem:[#allocation6 + $0x40] sm:$0xff] }
   0xf   :  { %v74_v8 = vld [vmem:[#allocation6 + $0x38] sm:$0xff]  ;;  %v73_v9 = vld [vmem:[#allocation6 + $0x30] sm:$0xff]  ;;  %v72_v10 = vld [vmem:[#allocation6 + $0x28] sm:$0xff] }
  0x10   :  { %v71_v11 = vld [vmem:[#allocation6 + $0x20] sm:$0xff]  ;;  %v70_v12 = vld [vmem:[#allocation6 + $0x18] sm:$0xff]  ;;  %v69_v13 = vld [vmem:[#allocation6 + $0x10] sm:$0xff] }
  0x11   :  { %242 = vmatpush.xpose.msra.mxu2 %v81_v1  ;;  %243 = vmatpush.xpose.msra.mxu3 %v81_v1  ;;  %v68_v14 = vld [vmem:[#allocation6 + $0x8] sm:$0xff]  ;;  %v67_v15 = vld [vmem:[#allocation6] sm:$0xff]  ;;  %v61_v24 = vld [vmem:[#allocation3 + $0x50] sm:$0xff] }
  0x12   :  { %88 = vmatpush.xpose.msra.mxu0 %v81_v1  ;;  %241 = vmatpush.xpose.msra.mxu1 %v81_v1  ;;  %v59_v16 = vld [vmem:[#allocation3 + $0x40] sm:$0xff]  ;;  %v60_v20 = vld [vmem:[#allocation3 + $0x48] sm:$0xff]  ;;  %v65_v25 = vld [vmem:[#allocation3 + $0x70] sm:$0xff] }
  0x13   :  { %v63_v17 = vld [vmem:[#allocation3 + $0x60] sm:$0xff]  ;;  %v64_v21 = vld [vmem:[#allocation3 + $0x68] sm:$0xff]  ;;  %v53_v26 = vld [vmem:[#allocation3 + $0x10] sm:$0xff] }
  0x14   :  { %v51_v18 = vld [vmem:[#allocation3] sm:$0xff]  ;;  %v52_v22 = vld [vmem:[#allocation3 + $0x8] sm:$0xff]  ;;  %v57_v27 = vld [vmem:[#allocation3 + $0x30] sm:$0xff] }
  0x15   :  { %245 = vmatpush.xpose.msra.mxu2 %v80_v2  ;;  %246 = vmatpush.xpose.msra.mxu3 %v80_v2  ;;  %v55_v19 = vld [vmem:[#allocation3 + $0x20] sm:$0xff]  ;;  %v56_v23 = vld [vmem:[#allocation3 + $0x28] sm:$0xff]  ;;  %v62_v28 = vld [vmem:[#allocation3 + $0x58] sm:$0xff] }
  0x16   :  { %89 = vmatpush.xpose.msra.mxu0 %v80_v2  ;;  %244 = vmatpush.xpose.msra.mxu1 %v80_v2  ;;  %v66_v29 = vld [vmem:[#allocation3 + $0x78] sm:$0xff]  ;;  %v415_v32 = vld [vmem:[%s463_s3] ss:$0 sm:$0xff]  ;;  %s222_s3 = sshll.u32 %s374_s0, 4  ;;  %s223_s3 = int_to_ptr.vmem [resolvable:$true] %s222_s3 }
  0x17   :  { %v54_v30 = vld [vmem:[#allocation3 + $0x18] sm:$0xff] }
  0x18   :  { %v58_v31 = vld [vmem:[#allocation3 + $0x38] sm:$0xff] }
  0x19   :  { %248 = vmatpush.xpose.msra.mxu2 %v79_v3  ;;  %249 = vmatpush.xpose.msra.mxu3 %v79_v3 }
  0x1a   :  { %90 = vmatpush.xpose.msra.mxu0 %v79_v3  ;;  %247 = vmatpush.xpose.msra.mxu1 %v79_v3 }
  0x1d   :  { %251 = vmatpush.xpose.msra.mxu2 %v78_v4  ;;  %252 = vmatpush.xpose.msra.mxu3 %v78_v4 }
  0x1e   :  { %91 = vmatpush.xpose.msra.mxu0 %v78_v4  ;;  %250 = vmatpush.xpose.msra.mxu1 %v78_v4 }
  0x21   :  { %254 = vmatpush.xpose.msra.mxu2 %v77_v5  ;;  %255 = vmatpush.xpose.msra.mxu3 %v77_v5 }
  0x22   :  { %92 = vmatpush.xpose.msra.mxu0 %v77_v5  ;;  %253 = vmatpush.xpose.msra.mxu1 %v77_v5 }
  0x25   :  { %257 = vmatpush.xpose.msra.mxu2 %v76_v6  ;;  %258 = vmatpush.xpose.msra.mxu3 %v76_v6 }
  0x26   :  { %93 = vmatpush.xpose.msra.mxu0 %v76_v6  ;;  %256 = vmatpush.xpose.msra.mxu1 %v76_v6 }
  0x29   :  { %260 = vmatpush.xpose.msra.mxu2 %v75_v7  ;;  %261 = vmatpush.xpose.msra.mxu3 %v75_v7 }
  0x2a   :  { %94 = vmatpush.xpose.msra.mxu0 %v75_v7  ;;  %259 = vmatpush.xpose.msra.mxu1 %v75_v7 }
  0x2d   :  { %263 = vmatpush.xpose.msra.mxu2 %v74_v8  ;;  %264 = vmatpush.xpose.msra.mxu3 %v74_v8 }
  0x2e   :  { %95 = vmatpush.xpose.msra.mxu0 %v74_v8  ;;  %262 = vmatpush.xpose.msra.mxu1 %v74_v8 }
  0x31   :  { %266 = vmatpush.xpose.msra.mxu2 %v73_v9  ;;  %267 = vmatpush.xpose.msra.mxu3 %v73_v9 }
  0x32   :  { %96 = vmatpush.xpose.msra.mxu0 %v73_v9  ;;  %265 = vmatpush.xpose.msra.mxu1 %v73_v9 }
  0x35   :  { %269 = vmatpush.xpose.msra.mxu2 %v72_v10  ;;  %270 = vmatpush.xpose.msra.mxu3 %v72_v10 }
  0x36   :  { %97 = vmatpush.xpose.msra.mxu0 %v72_v10  ;;  %268 = vmatpush.xpose.msra.mxu1 %v72_v10 }
  0x39   :  { %272 = vmatpush.xpose.msra.mxu2 %v71_v11  ;;  %273 = vmatpush.xpose.msra.mxu3 %v71_v11 }
  0x3a   :  { %98 = vmatpush.xpose.msra.mxu0 %v71_v11  ;;  %271 = vmatpush.xpose.msra.mxu1 %v71_v11 }
  0x3d   :  { %275 = vmatpush.xpose.msra.mxu2 %v70_v12  ;;  %276 = vmatpush.xpose.msra.mxu3 %v70_v12 }
  0x3e   :  { %99 = vmatpush.xpose.msra.mxu0 %v70_v12  ;;  %274 = vmatpush.xpose.msra.mxu1 %v70_v12 }
  0x41   :  { %278 = vmatpush.xpose.msra.mxu2 %v69_v13  ;;  %279 = vmatpush.xpose.msra.mxu3 %v69_v13 }
  0x42   :  { %100 = vmatpush.xpose.msra.mxu0 %v69_v13  ;;  %277 = vmatpush.xpose.msra.mxu1 %v69_v13 }
  0x45   :  { %281 = vmatpush.xpose.msra.mxu2 %v68_v14  ;;  %282 = vmatpush.xpose.msra.mxu3 %v68_v14 }
  0x46   :  { %101 = vmatpush.xpose.msra.mxu0 %v68_v14  ;;  %280 = vmatpush.xpose.msra.mxu1 %v68_v14 }
  0x49   :  { %284 = vmatpush.xpose.msra.mxu2 %v67_v15  ;;  %285 = vmatpush.xpose.msra.mxu3 %v67_v15 }
  0x4a   :  { %102 = vmatpush.xpose.msra.mxu0 %v67_v15  ;;  %283 = vmatpush.xpose.msra.mxu1 %v67_v15 }
  0x4c   :  { %127 = vmatmul.f32.vlgmr.msra.gmra.mxu2 %v59_v16  ;;  %139 = vmatmul.f32.vlgmr.msra.gmra.mxu3 %v63_v17 }
  0x4d   :  { %103 = vmatmul.f32.vlgmr.msra.gmra.mxu0 %v51_v18  ;;  %115 = vmatmul.f32.vlgmr.msra.gmra.mxu1 %v55_v19 }
  0x54   :  { %130 = vmatmul.f32.gmra.mxu2 %v60_v20  ;;  %142 = vmatmul.f32.gmra.mxu3 %v64_v21 }
  0x55   :  { %106 = vmatmul.f32.gmra.mxu0 %v52_v22  ;;  %118 = vmatmul.f32.gmra.mxu1 %v56_v23 }
  0x5c   :  { %133 = vmatmul.f32.gmra.mxu2 %v61_v24  ;;  %145 = vmatmul.f32.gmra.mxu3 %v65_v25 }
  0x5d   :  { %109 = vmatmul.f32.gmra.mxu0 %v53_v26  ;;  %121 = vmatmul.f32.gmra.mxu1 %v57_v27 }
  0x64   :  { %136 = vmatmul.f32.gmra.mxu2 %v62_v28  ;;  %148 = vmatmul.f32.gmra.mxu3 %v66_v29 }
  0x65   :  { %112 = vmatmul.f32.gmra.mxu0 %v54_v30  ;;  %124 = vmatmul.f32.gmra.mxu1 %v58_v31 }
  0xca   :  { %v104_v33 = vpop.f32.mrf.mxu0  ;;  %v116_v35 = vpop.f32.mrf.mxu1 }
  0xcb   :  { %v105_v36 = vadd.f32 %v415_v32, %v104_v33  ;;  %v117_v37 = vadd.f32 %v415_v32, %v116_v35 }
  0xcd   :  { %vm153_vm0 = vcmp.gt.f32.partialorder %v105_v36, 0.0  ;;  %v170_v38 = vmul.f32 %v420_v34, %v105_v36  ;;  %vm157_vm1 = vcmp.gt.f32.partialorder %v117_v37, 0.0  ;;  %v174_v39 = vmul.f32 %v420_v34, %v117_v37 }
  0xcf   :  { %v186_v40 = vsel %vm153_vm0, %v105_v36, %v170_v38  ;;  %v190_v41 = vsel %vm157_vm1, %v117_v37, %v174_v39  ;;  %v128_v42 = vpop.f32.mrf.mxu2  ;;  %v140_v43 = vpop.f32.mrf.mxu3 }
  0xd0   :  { %202 = vst [vmem:[#allocation8] sm:$0xff] %v186_v40  ;;  %v129_v44 = vadd.f32 %v415_v32, %v128_v42  ;;  %v141_v45 = vadd.f32 %v415_v32, %v140_v43 }
  0xd1   :  { %206 = vst [vmem:[#allocation8 + $0x20] sm:$0xff] %v190_v41 }
  0xd2   :  { %vm161_vm2 = vcmp.gt.f32.partialorder %v129_v44, 0.0  ;;  %v178_v46 = vmul.f32 %v420_v34, %v129_v44  ;;  %vm165_vm3 = vcmp.gt.f32.partialorder %v141_v45, 0.0  ;;  %v182_v47 = vmul.f32 %v420_v34, %v141_v45  ;;  %v107_v48 = vpop.f32.mrf.mxu0  ;;  %v119_v49 = vpop.f32.mrf.mxu1 }
  0xd3   :  { %v108_v50 = vadd.f32 %v415_v32, %v107_v48  ;;  %v120_v51 = vadd.f32 %v415_v32, %v119_v49 }
  0xd4   :  { %v194_v52 = vsel %vm161_vm2, %v129_v44, %v178_v46  ;;  %v198_v53 = vsel %vm165_vm3, %v141_v45, %v182_v47 }
  0xd5   :  { %210 = vst [vmem:[#allocation8 + $0x40] sm:$0xff] %v194_v52  ;;  %vm154_vm4 = vcmp.gt.f32.partialorder %v108_v50, 0.0  ;;  %v171_v54 = vmul.f32 %v420_v34, %v108_v50  ;;  %vm158_vm5 = vcmp.gt.f32.partialorder %v120_v51, 0.0  ;;  %v175_v55 = vmul.f32 %v420_v34, %v120_v51 }
  0xd6   :  { %214 = vst [vmem:[#allocation8 + $0x60] sm:$0xff] %v198_v53 }
  0xd7   :  { %v187_v56 = vsel %vm154_vm4, %v108_v50, %v171_v54  ;;  %v191_v57 = vsel %vm158_vm5, %v120_v51, %v175_v55  ;;  %v131_v58 = vpop.f32.mrf.mxu2  ;;  %v143_v59 = vpop.f32.mrf.mxu3 }
  0xd8   :  { %203 = vst [vmem:[#allocation8 + $0x8] sm:$0xff] %v187_v56  ;;  %v132_v60 = vadd.f32 %v415_v32, %v131_v58  ;;  %v144_v61 = vadd.f32 %v415_v32, %v143_v59 }
  0xd9   :  { %207 = vst [vmem:[#allocation8 + $0x28] sm:$0xff] %v191_v57 }
  0xda   :  { %vm162_vm6 = vcmp.gt.f32.partialorder %v132_v60, 0.0  ;;  %v179_v62 = vmul.f32 %v420_v34, %v132_v60  ;;  %vm166_vm7 = vcmp.gt.f32.partialorder %v144_v61, 0.0  ;;  %v183_v63 = vmul.f32 %v420_v34, %v144_v61  ;;  %v110_v0 = vpop.f32.mrf.mxu0  ;;  %v122_v1 = vpop.f32.mrf.mxu1 }
  0xdb   :  { %v111_v2 = vadd.f32 %v415_v32, %v110_v0  ;;  %v123_v3 = vadd.f32 %v415_v32, %v122_v1 }
  0xdc   :  { %v195_v4 = vsel %vm162_vm6, %v132_v60, %v179_v62  ;;  %v199_v5 = vsel %vm166_vm7, %v144_v61, %v183_v63 }
  0xdd   :  { %211 = vst [vmem:[#allocation8 + $0x48] sm:$0xff] %v195_v4  ;;  %vm155_vm8 = vcmp.gt.f32.partialorder %v111_v2, 0.0  ;;  %v172_v6 = vmul.f32 %v420_v34, %v111_v2  ;;  %vm159_vm9 = vcmp.gt.f32.partialorder %v123_v3, 0.0  ;;  %v176_v7 = vmul.f32 %v420_v34, %v123_v3 }
  0xde   :  { %215 = vst [vmem:[#allocation8 + $0x68] sm:$0xff] %v199_v5 }
  0xdf   :  { %v188_v8 = vsel %vm155_vm8, %v111_v2, %v172_v6  ;;  %v192_v9 = vsel %vm159_vm9, %v123_v3, %v176_v7  ;;  %v134_v10 = vpop.f32.mrf.mxu2  ;;  %v146_v11 = vpop.f32.mrf.mxu3 }
  0xe0   :  { %204 = vst [vmem:[#allocation8 + $0x10] sm:$0xff] %v188_v8  ;;  %v135_v12 = vadd.f32 %v415_v32, %v134_v10  ;;  %v147_v13 = vadd.f32 %v415_v32, %v146_v11 }
  0xe1   :  { %208 = vst [vmem:[#allocation8 + $0x30] sm:$0xff] %v192_v9 }
  0xe2   :  { %vm163_vm10 = vcmp.gt.f32.partialorder %v135_v12, 0.0  ;;  %v180_v14 = vmul.f32 %v420_v34, %v135_v12  ;;  %vm167_vm11 = vcmp.gt.f32.partialorder %v147_v13, 0.0  ;;  %v184_v15 = vmul.f32 %v420_v34, %v147_v13  ;;  %v113_v16 = vpop.f32.mrf.mxu0  ;;  %v125_v17 = vpop.f32.mrf.mxu1 }
  0xe3   :  { %v114_v18 = vadd.f32 %v415_v32, %v113_v16  ;;  %v126_v19 = vadd.f32 %v415_v32, %v125_v17 }
  0xe4   :  { %v196_v20 = vsel %vm163_vm10, %v135_v12, %v180_v14  ;;  %v200_v21 = vsel %vm167_vm11, %v147_v13, %v184_v15 }
  0xe5   :  { %212 = vst [vmem:[#allocation8 + $0x50] sm:$0xff] %v196_v20  ;;  %vm156_vm12 = vcmp.gt.f32.partialorder %v114_v18, 0.0  ;;  %v173_v22 = vmul.f32 %v420_v34, %v114_v18  ;;  %vm160_vm13 = vcmp.gt.f32.partialorder %v126_v19, 0.0  ;;  %v177_v23 = vmul.f32 %v420_v34, %v126_v19 }
  0xe6   :  { %216 = vst [vmem:[#allocation8 + $0x70] sm:$0xff] %v200_v21 }
  0xe7   :  { %v189_v24 = vsel %vm156_vm12, %v114_v18, %v173_v22  ;;  %v193_v25 = vsel %vm160_vm13, %v126_v19, %v177_v23  ;;  %v137_v26 = vpop.f32.mrf.mxu2  ;;  %v149_v27 = vpop.f32.mrf.mxu3 }
  0xe8   :  { %205 = vst [vmem:[#allocation8 + $0x18] sm:$0xff] %v189_v24  ;;  %v138_v28 = vadd.f32 %v415_v32, %v137_v26  ;;  %v150_v29 = vadd.f32 %v415_v32, %v149_v27 }
  0xe9   :  { %209 = vst [vmem:[#allocation8 + $0x38] sm:$0xff] %v193_v25 }
  0xea   :  { %vm164_vm14 = vcmp.gt.f32.partialorder %v138_v28, 0.0  ;;  %v181_v30 = vmul.f32 %v420_v34, %v138_v28  ;;  %vm168_vm15 = vcmp.gt.f32.partialorder %v150_v29, 0.0  ;;  %v185_v31 = vmul.f32 %v420_v34, %v150_v29 }
  0xec   :  { %v197_v33 = vsel %vm164_vm14, %v138_v28, %v181_v30  ;;  %v201_v35 = vsel %vm168_vm15, %v150_v29, %v185_v31 }
  0xed   :  { %213 = vst [vmem:[#allocation8 + $0x58] sm:$0xff] %v197_v33 }
  0xee   :  { %217 = vst [vmem:[#allocation8 + $0x78] sm:$0xff] %v201_v35 }
  0xef   :  { %230 = dma.vmem_to_hbm [thread:$0]  %s223_s3, 2048, %s225_s5, [#allocation5], %s371_s23, %s371_s23, %s372_s24  }
  0xf0   :  { %368 = dma.done.wait [#allocation5], 2048  }
  0xf1   :  { %369 = vsyncadd [#allocation5], 4294965248 }
  0xf2   :  { %235 = vsyncpa [#allocation4], 1 }
  0xf3   :  { %236 = vsyncpa [#allocation7], 1 }
  0xf4   :  { %237 = vsyncpa [#allocation5], 1 }

</bundles_post_ra>
